<compile_context>
chip_gen: v5e
topology: v5e:2x2
jax: 0.10.0
libtpu: 0.0.40
codegen_flags: <defaults>
</compile_context>

<pallas_src>
import jax
import jax.numpy as jnp
from jax.experimental import pallas as pl
from jax.experimental.pallas import tpu as pltpu


def _invconv_kernel(w_ref, x_ref, out_ref):
    # 1x1 conv == channel-mixing matmul on the MXU.
    # w_ref: (C, C)   x_ref/out_ref: (1, C, TN)
    out_ref[0] = jnp.dot(
        w_ref[...], x_ref[0], preferred_element_type=jnp.float32
    ).astype(out_ref.dtype)


def _pick_lane_tile(c, hw, itemsize, vmem_budget_bytes=8 * 1024 * 1024,
                    max_tile=16384):
    """Lane-axis tile: multiple of 128 (or full extent), sized for VMEM budget.

    Budget covers double-buffered input + output blocks: 4 * C * TN * itemsize.
    Conservative enough for v5e's 16 MiB / v7x's 32 MiB default scoped VMEM.
    """
    cap = vmem_budget_bytes // (4 * c * itemsize)
    cap = max(128, (cap // 128) * 128)
    cap = min(cap, max_tile)
    if hw <= cap:
        return hw        # full array dim as a single block is always legal
    return cap           # 128-multiple tile, grid handles the edge block


def invconv2d_lu_forward(x, weight, w_s):
    """Forward of InvConv2dLU. x: (B, C, H, W) NCHW. Returns (out, logdet)."""
    B, C, H, W = x.shape
    HW = H * W

    # Free reshape (NCHW is channel-major contiguous per batch element).
    x3 = x.reshape(B, C, HW)
    # Explicit promotion decision: weight follows activation dtype; MXU
    # accumulates in f32 via preferred_element_type.
    weight = weight.astype(x.dtype)

    itemsize = jnp.dtype(x.dtype).itemsize
    tn = _pick_lane_tile(C, HW, itemsize)
    grid = (B, pl.cdiv(HW, tn))

    out3 = pl.pallas_call(
        _invconv_kernel,
        out_shape=jax.ShapeDtypeStruct((B, C, HW), x.dtype),
        grid_spec=pltpu.PrefetchScalarGridSpec(
            num_scalar_prefetch=0,
            grid=grid,
            in_specs=[
                # Weight stays resident across the whole grid.
                pl.BlockSpec((C, C), lambda b, n: (0, 0)),
                # Activations: one batch element, TN lanes per step.
                pl.BlockSpec((1, C, tn), lambda b, n: (b, 0, n)),
            ],
            out_specs=pl.BlockSpec((1, C, tn), lambda b, n: (b, 0, n)),
        ),
        compiler_params=pltpu.CompilerParams(
            dimension_semantics=("parallel", "parallel")),
        cost_estimate=pl.CostEstimate(
            flops=2 * C * C * B * HW,
            transcendentals=0,
            bytes_accessed=2 * B * C * HW * itemsize + C * C * itemsize),
    )(weight, x3)

    out = out3.reshape(B, C, H, W)
    # Tiny C-length reduction: plain JAX, outside the kernel hot loop.
    logdet = (H * W) * jnp.sum(w_s)
    return out, logdet


def make_invconv_params(key, inchannels):
    """Deterministic parameter construction mirroring InvConv2dLU.__init__."""
    w_init = jax.random.normal(key, (inchannels, inchannels), dtype=jnp.float32)
    q, _ = jnp.linalg.qr(w_init)
    w_p, w_l, w_u_full = jax.scipy.linalg.lu(q)
    w_s_diag = jnp.diag(w_u_full)
    w_u = jnp.triu(w_u_full, 1)
    u_mask = jnp.triu(jnp.ones((inchannels, inchannels), jnp.float32), 1)
    l_mask = u_mask.T
    s_sign = jnp.sign(w_s_diag)
    l_eye = jnp.eye(inchannels, dtype=jnp.float32)
    w_s = jnp.log(jnp.abs(w_s_diag))  # logabs
    return dict(w_p=w_p, w_l=w_l, w_u=w_u, w_s=w_s,
                u_mask=u_mask, l_mask=l_mask, s_sign=s_sign, l_eye=l_eye)


def calc_weight(p):
    """calc_weight(): tiny CxC parameter assembly (plain JAX glue)."""
    return p["w_p"] @ (p["w_l"] * p["l_mask"] + p["l_eye"]) @ (
        p["w_u"] * p["u_mask"] + jnp.diag(p["s_sign"] * jnp.exp(p["w_s"]))
    )


if __name__ == "__main__":
    B, C, H, W = 2, 4, 16, 16
    key = jax.random.PRNGKey(0)
    k_param, k_x = jax.random.split(key)

    params = make_invconv_params(k_param, C)
    weight = calc_weight(params)                       # (C, C) 1x1 conv kernel
    x = jax.random.normal(k_x, (B, C, H, W), dtype=jnp.float32)

    out, logdet = jax.jit(invconv2d_lu_forward)(x, weight, params["w_s"])
    jax.block_until_ready((out, logdet))

    # Reference (plain JAX) forward for validation.
    ref_out = jnp.einsum("oc,bchw->bohw", weight, x)
    ref_logdet = H * W * jnp.sum(params["w_s"])

    assert out.shape == (B, C, H, W)
    assert jnp.allclose(out, ref_out, atol=1e-4, rtol=1e-4)
    assert jnp.allclose(logdet, ref_logdet, atol=1e-4, rtol=1e-4)
    print("KERNEL_OK")
</pallas_src>

<mosaic_0001>
module attributes {stable_mosaic.version = 11 : i64} {
  func.func @_invconv_kernel(%arg0: i32, %arg1: i32, %arg2: memref<4x4xf32, #tpu.memory_space<vmem>>, %arg3: memref<1x4x256xf32, #tpu.memory_space<vmem>>, %arg4: memref<1x4x256xf32, #tpu.memory_space<vmem>>) attributes {dimension_semantics = [#tpu.dimension_semantics<parallel>, #tpu.dimension_semantics<parallel>], iteration_bounds = array<i64: 2, 1>, scalar_prefetch = 0 : i64, scratch_operands = 0 : i64, tpu.core_type = #tpu.core_type<tc>, window_params = [{pipeline_mode = #tpu.pipeline_mode<synchronous>, transform_indices = @transform_0, window_bounds = array<i64: 4, 4>}, {transform_indices = @transform_1, window_bounds = array<i64: 1, 4, 256>}, {transform_indices = @transform_2, window_bounds = array<i64: 1, 4, 256>}]} {
    %c0 = arith.constant 0 : index
    %c0_0 = arith.constant 0 : index
    %0 = vector.load %arg2[%c0, %c0_0] : memref<4x4xf32, #tpu.memory_space<vmem>>, vector<4x4xf32>
    %c0_1 = arith.constant 0 : index
    %c0_2 = arith.constant 0 : index
    %c0_3 = arith.constant 0 : index
    %1 = vector.load %arg3[%c0_1, %c0_2, %c0_3] : memref<1x4x256xf32, #tpu.memory_space<vmem>>, vector<1x4x256xf32>
    %2 = vector.shape_cast %1 : vector<1x4x256xf32> to vector<4x256xf32>
    %cst = arith.constant dense<0.000000e+00> : vector<4x256xf32>
    %3 = tpu.matmul %0, %2, %cst {dimension_numbers = #tpu.dot_dimension_numbers<[1], [0], [0], [1], [0, 0, 1, 1], [], []>} : vector<4x4xf32>, vector<4x256xf32>, vector<4x256xf32> -> vector<4x256xf32>
    %c0_4 = arith.constant 0 : index
    %c0_5 = arith.constant 0 : index
    %c0_6 = arith.constant 0 : index
    %4 = vector.load %arg4[%c0_4, %c0_5, %c0_6] : memref<1x4x256xf32, #tpu.memory_space<vmem>>, vector<1x4x256xf32>
    %5 = vector.shape_cast %4 : vector<1x4x256xf32> to vector<4x256xf32>
    %6 = vector.shape_cast %3 : vector<4x256xf32> to vector<1x4x256xf32>
    tpu.vector_store %arg4[%c0_4, %c0_5, %c0_6], %6 {strides = array<i32>} : memref<1x4x256xf32, #tpu.memory_space<vmem>>, vector<1x4x256xf32>,
    return
  }
  func.func @transform_0(%arg0: i32, %arg1: i32) -> (i32, i32) {
    %c0_i32 = arith.constant 0 : i32
    %c0_i32_0 = arith.constant 0 : i32
    %c0_i32_1 = arith.constant 0 : i32
    return %c0_i32, %c0_i32_0 : i32, i32
  }
  func.func @transform_1(%arg0: i32, %arg1: i32) -> (i32, i32, i32) {
    %c0_i32 = arith.constant 0 : i32
    %c0_i32_0 = arith.constant 0 : i32
    return %arg0, %c0_i32, %arg1 : i32, i32, i32
  }
  func.func @transform_2(%arg0: i32, %arg1: i32) -> (i32, i32, i32) {
    %c0_i32 = arith.constant 0 : i32
    %c0_i32_0 = arith.constant 0 : i32
    return %arg0, %c0_i32, %arg1 : i32, i32, i32
  }
}

</mosaic_0001>

<bundles_post_ra>
// kernel: invconv2d_lu_forward.1
= control target key start
LH: loop header
LB: loop body
LE: loop exit
PB: predicated region body
PF: predicated region fallthrough
CT: control target
= control target key end

     0   :  { %s411_s9 = smov 0   ;;  %s413_s10 = smov 0   ;;  %s444_s0 = inlined_call_operand.vmem [shape: f32[4,4], index: 0, kind: input, shape index: {}]   ;;  %s445_s1 = inlined_call_operand.vmem [shape: f32[2,4,256], index: 1, kind: input, shape index: {}]   ;;  %s446_s2 = inlined_call_operand.vmem [shape: f32[2,4,256], index: 2, kind: output, shape index: {}]  }
   0x1   :  { %s415_s11 = smov 0  }
   0x2 LB: > { %s24_s12 = sadd.s32 1, %s390_s10  ;;  %p335_p0 = scmp.ge.s32.totalorder %s394_s11, 1  ;;  %s394_s11 = sphi %s415_s11, %s12_s11   ;;  %s390_s10 = sphi %s413_s10, %s448_s10   ;;  %s386_s9 = sphi %s411_s9, %s447_s9  }
   0x3   : > { %p26_p1 = scmp.ge.s32.totalorder %s24_s12, 2  ;;  %p133_p2 = scmp.lt.s32.totalorder %s394_s11, 3 }
   0x5   : > { %s450_s12 = smov (%p26_p1, %s24_s12), 0  ;;  %p134_p3 = pnand %p335_p0, %p133_p2 }
   0x6   : > { %p164_p4 = scmp.lt.s32.totalorder (!%p134_p3), %s386_s9, 1 }
   0x7   : > { %137 = sbr.rel (%p134_p3) target bundleno = 155 (0x9b), region = 28 }
   0xc   : > { %s452_s9 = smov (!%p164_p4, %s386_s9), 1  ;;  %vm193_vm0 = vcmask 1043456   ;;  %v183_v1 = vld [vmem:[%s444_s0] sm:$0xf]  ;;  %vm189_vm1 = vcmask 31744  }
   0xd   : > { %s346_s13 = sshll.u32 %s452_s9, 3 }
   0xe   : > { %s171_s16 = scalar_lea.vmem %s445_s1, %s346_s13  ;;  %s181_s21 = scalar_lea.vmem %s446_s2, %s346_s13 }
   0xf   : > { %v184_v0 = vld [vmem:[%s171_s16] sm:$0xff] }
  0x10   : > { %186 = vst [vmem:[#allocation1] ss:$2 sm:$0xff] %v184_v0 }
  0x17   : > { %v188_v2 = vld.sshfl [vmem:[#allocation1 + $0x8] sm:$0xff pattern:$0x75316420]  ;;  %v187_v3 = vld.sshfl [vmem:[#allocation1] sm:$0xff pattern:$0x75316420] }
  0x18   : > { %342 = vmatpush.msk.msra.mxu1 %vm193_vm0, %v188_v2  ;;  %340 = vmatpush.msk.msra.mxu0 %vm193_vm0, %v187_v3 }
  0x19   : > { %343 = vmatmul.msk.f32.vlgmr.msra.gmra.mxu1 %vm189_vm1, %v183_v1  ;;  %341 = vmatmul.msk.f32.vlgmr.msra.gmra.mxu0 %vm189_vm1, %v183_v1 }
  0x96   : > { %v235_v4 = vpop.f32.mrf.mxu1  ;;  %v215_v5 = vpop.f32.mrf.mxu0 }
  0x97   : > { %v240_v6 = vrot.slane %v235_v4, 4 }
  0x99   : > { %v241_v7 = vsel %vm193_vm0, %v215_v5, %v240_v6 }
  0x9a   : > { %243 = vst [vmem:[%s181_s21] sm:$0xff] %v241_v7 }
  0x9b PF: > { %s12_s11 = sadd.s32 1, %s394_s11   ;;  %s447_s9 = smov %s390_s10 }
  0x9c   : > { %p9_p5 = scmp.ge.s32.totalorder %s12_s11, 4   ;;  %s448_s10 = smov %s450_s12 }
  0x9e   :  { %11 = sbr.rel (!%p9_p5) target bundleno = 2 (0x2), region = 58 }

</bundles_post_ra>
